<compile_context>
chip_gen: v6e
topology: v6e:2x2x1
jax: 0.10.0
libtpu: 0.0.40
codegen_flags: <defaults>
</compile_context>

<pallas_src>
import math

import jax
import jax.numpy as jnp
from jax.experimental import pallas as pl
from jax.experimental.pallas import tpu as pltpu


def _vmem_config():
    """(vmem_limit_bytes, tile_cap_m, tile_cap_k) for the current TPU generation."""
    try:
        phys = pltpu.get_tpu_info().vmem_capacity_bytes
    except Exception:
        phys = 64 * 1024 * 1024                    # assume the smallest (v7x-like)
    if phys >= 100 * 1024 * 1024:                  # v5e / v6e: 128 MiB physical VMEM
        return 104 * 1024 * 1024, 2048, 4096
    return 56 * 1024 * 1024, 2048, 2048            # v7x: 64 MiB physical VMEM


def _pick_tile(dim, desired, align=128):
    """Largest multiple of `align` dividing `dim` (itself a multiple of align), <= desired."""
    t = max(align, (min(desired, dim) // align) * align)
    while dim % t:
        t -= align
    return t


def _fits_vmem(tm, tk, fin, fp, out_itemsize, limit):
    """Approximate double-buffered VMEM footprint of one grid step (90% headroom)."""
    adj_b = 2 * tm * tk * 4          # f32 adj tiles, double-buffered
    x_b = 2 * tk * fin * 4           # X k-slab
    w_b = 2 * fin * fp * 4           # resident weight
    acc_b = tm * fp * 4              # f32 accumulator scratch
    out_b = 2 * tm * fp * out_itemsize
    return adj_b + x_b + w_b + acc_b + out_b <= int(limit * 0.9)


def _gcn_fused_kernel(adj_ref, x_ref, w_ref, o_ref, acc_ref):
    """One (row-tile i, k-slab k) step: acc += adj[i,k] @ (X[k] @ W)."""
    k = pl.program_id(1)

    @pl.when(k == 0)
    def _init():
        acc_ref[...] = jnp.zeros_like(acc_ref)

    # Fused stage 1: support_k = X[k-slab] @ W. Recomputed per row tile; the
    # extra FLOPs are ~Fin/tk of the main contraction, and `support` never
    # touches HBM.
    support_k = jnp.dot(
        x_ref[...].astype(jnp.bfloat16),
        w_ref[...].astype(jnp.bfloat16),
        preferred_element_type=jnp.float32,
    ).astype(jnp.bfloat16)

    # adj arrives from HBM in its native dtype (f32: 4 B/elem, no extra cast
    # pass); cast per-tile in VMEM for bf16 MXU inputs. Accumulation is f32.
    acc_ref[...] += jnp.dot(
        adj_ref[...].astype(jnp.bfloat16),
        support_k,
        preferred_element_type=jnp.float32,
    )

    @pl.when(k == pl.num_programs(1) - 1)
    def _finalize():
        o_ref[...] = acc_ref[...].astype(o_ref.dtype)


def graph_convolution(x, adj, weight, bias=None, *, tile_m=None, tile_k=None,
                      out_dtype=None):
    """x: (B, N, Fin); adj: (B*N, B*N); weight: (Fin, Fout). bias optional."""
    B, N, Fin = x.shape
    Fout = weight.shape[1]
    BN = B * N
    assert adj.shape == (BN, BN), "adj must be (B*N, B*N)"

    out_dtype = x.dtype if out_dtype is None else out_dtype
    vmem_limit, cap_m, cap_k = _vmem_config()

    # Lane-dense output: pad Fout to the next multiple of 128 only (full-width
    # stores, full MXU lanes), sliced off at the end.
    Fp = max(128, ((Fout + 127) // 128) * 128)

    # Pad BN up to a multiple of 128 so tiling never degenerates into a single
    # (BN, BN) block for non-aligned graph sizes. Zero rows/cols contribute
    # nothing and are sliced off below.
    BNp = ((BN + 127) // 128) * 128

    x2d = x.reshape(BN, Fin)
    if BNp != BN:
        x2d = jnp.pad(x2d, ((0, BNp - BN), (0, 0)))
        adj = jnp.pad(adj, ((0, BNp - BN), (0, BNp - BN)))
    w_p = jnp.pad(weight, ((0, 0), (0, Fp - Fout))) if Fp != Fout else weight

    # Tile selection: big tiles amortize the ~0.35 us per-grid-step overhead
    # (a 2048x2048 f32 adj tile is 16 MiB ~ 12 us of DMA on v6e).
    if tile_m is None:
        tile_m = 2048 if Fp <= 128 else 1024
    if tile_k is None:
        tile_k = cap_k if Fp <= 128 else 1024
    tile_m = min(tile_m, cap_m)
    tile_k = min(tile_k, cap_k)
    if BNp >= 256:
        # Keep >= 2 row tiles on the "parallel" axis so both v7x TCs get work.
        tile_m = min(tile_m, BNp // 2)
    tm = _pick_tile(BNp, tile_m)
    tk = _pick_tile(BNp, tile_k)

    out_isz = jnp.dtype(out_dtype).itemsize
    while tk > 128 and not _fits_vmem(tm, tk, Fin, Fp, out_isz, vmem_limit):
        tk = _pick_tile(BNp, tk - 128)
    while tm > 128 and not _fits_vmem(tm, tk, Fin, Fp, out_isz, vmem_limit):
        tm = _pick_tile(BNp, tm - 128)

    grid = (BNp // tm, BNp // tk)

    out2d = pl.pallas_call(
        _gcn_fused_kernel,
        out_shape=jax.ShapeDtypeStruct((BNp, Fp), out_dtype),
        grid_spec=pltpu.PrefetchScalarGridSpec(
            num_scalar_prefetch=0,
            grid=grid,
            in_specs=[
                pl.BlockSpec((tm, tk), lambda i, k: (i, k)),    # adj tile (f32 stream)
                pl.BlockSpec((tk, Fin), lambda i, k: (k, 0)),   # X k-slab
                pl.BlockSpec((Fin, Fp), lambda i, k: (0, 0)),   # W (small, resident)
            ],
            out_specs=pl.BlockSpec((tm, Fp), lambda i, k: (i, 0)),
            scratch_shapes=[pltpu.VMEM((tm, Fp), jnp.float32)],
        ),
        compiler_params=pltpu.CompilerParams(
            dimension_semantics=("parallel", "arbitrary"),
            vmem_limit_bytes=vmem_limit,
        ),
    )(adj, x2d, w_p)

    out = out2d[:BN, :Fout]
    if bias is not None:
        # Matches the PyTorch bias branch, which returns the flat (B*N, Fout).
        return out + bias
    return out.reshape(B, N, Fout)


def init_weight(key, in_features, out_features):
    # Matches reset_parameters(): uniform(-stdv, stdv), stdv = 1/sqrt(out_features).
    stdv = 1.0 / math.sqrt(out_features)
    return jax.random.uniform(
        key, (in_features, out_features), dtype=jnp.float32, minval=-stdv, maxval=stdv
    )


def _reference(x, adj, weight):
    B, N, Fin = x.shape
    BN = B * N
    support = x.reshape(BN, Fin) @ weight
    return (adj @ support).reshape(B, N, weight.shape[1])


if __name__ == "__main__":
    key = jax.random.PRNGKey(0)
    k1, k2 = jax.random.split(key)

    def run_case(case_key, B, N, Fin, Fout, **kw):
        kx, kadj, kw_ = jax.random.split(case_key, 3)
        BN = B * N
        x = jax.random.normal(kx, (B, N, Fin), dtype=jnp.float32)
        adj = jax.random.uniform(kadj, (BN, BN), dtype=jnp.float32)
        weight = init_weight(kw_, Fin, Fout)

        out = graph_convolution(x, adj, weight, **kw)
        out = jax.block_until_ready(out)

        ref = _reference(x, adj, weight)
        assert out.shape == (B, N, Fout)
        # bf16 MXU inputs with f32 accumulation -> loosened tolerance vs f32 ref.
        assert jnp.allclose(out, ref, atol=2e-1, rtol=2e-2), (
            f"mismatch: max abs err = {float(jnp.max(jnp.abs(out - ref)))}"
        )

    # Case 1: BN = 384 with forced 128-wide tiles -> 3x3 grid; exercises the
    # f32 accumulator init/accumulate/finalize over K and parallel M sharding.
    run_case(k1, B=2, N=192, Fin=32, Fout=32, tile_m=128, tile_k=128)

    # Case 2: BN = 200 (not 128-aligned) with default tile selection; exercises
    # the BN-padding path, generation-aware config, and Fout padding (40 -> 128).
    run_case(k2, B=2, N=100, Fin=24, Fout=40)

    print("KERNEL_OK")
</pallas_src>

<mosaic_0001>
module attributes {stable_mosaic.version = 11 : i64} {
  func.func @_gcn_fused_kernel(%arg0: i32, %arg1: i32, %arg2: memref<128x128xf32, #tpu.memory_space<vmem>>, %arg3: memref<128x32xf32, #tpu.memory_space<vmem>>, %arg4: memref<32x128xf32, #tpu.memory_space<vmem>>, %arg5: memref<128x128xf32, #tpu.memory_space<vmem>>, %arg6: memref<128x128xf32, #tpu.memory_space<vmem>>) attributes {dimension_semantics = [#tpu.dimension_semantics<parallel>, #tpu.dimension_semantics<arbitrary>], iteration_bounds = array<i64: 3, 3>, scalar_prefetch = 0 : i64, scratch_operands = 1 : i64, tpu.core_type = #tpu.core_type<tc>, window_params = [{transform_indices = @transform_0, window_bounds = array<i64: 128, 128>}, {transform_indices = @transform_1, window_bounds = array<i64: 128, 32>}, {pipeline_mode = #tpu.pipeline_mode<synchronous>, transform_indices = @transform_2, window_bounds = array<i64: 32, 128>}, {transform_indices = @transform_3, window_bounds = array<i64: 128, 128>}]} {
    %c0_i32 = arith.constant 0 : i32
    %0 = arith.cmpi eq, %arg1, %c0_i32 : i32
    %1 = arith.extui %0 : i1 to i32
    %c0_i32_0 = arith.constant 0 : i32
    %2 = arith.cmpi ne, %1, %c0_i32_0 : i32
    scf.if %2 {
      %cst_12 = arith.constant 0.000000e+00 : f32
      %18 = vector.broadcast %cst_12 : f32 to vector<128x128xf32>
      %c0_13 = arith.constant 0 : index
      %c0_14 = arith.constant 0 : index
      %19 = vector.load %arg6[%c0_13, %c0_14] : memref<128x128xf32, #tpu.memory_space<vmem>>, vector<128x128xf32>
      tpu.vector_store %arg6[%c0_13, %c0_14], %18 {strides = array<i32>} : memref<128x128xf32, #tpu.memory_space<vmem>>, vector<128x128xf32>,
    } else {
    }
    %c0 = arith.constant 0 : index
    %c0_1 = arith.constant 0 : index
    %3 = vector.load %arg3[%c0, %c0_1] : memref<128x32xf32, #tpu.memory_space<vmem>>, vector<128x32xf32>
    %4 = arith.truncf %3 : vector<128x32xf32> to vector<128x32xbf16>
    %c0_2 = arith.constant 0 : index
    %c0_3 = arith.constant 0 : index
    %5 = vector.load %arg4[%c0_2, %c0_3] : memref<32x128xf32, #tpu.memory_space<vmem>>, vector<32x128xf32>
    %6 = arith.truncf %5 : vector<32x128xf32> to vector<32x128xbf16>
    %cst = arith.constant dense<0.000000e+00> : vector<128x128xf32>
    %7 = tpu.matmul %4, %6, %cst {dimension_numbers = #tpu.dot_dimension_numbers<[1], [0], [0], [1], [0, 0, 1, 1], [], []>} : vector<128x32xbf16>, vector<32x128xbf16>, vector<128x128xf32> -> vector<128x128xf32>
    %8 = arith.truncf %7 : vector<128x128xf32> to vector<128x128xbf16>
    %c0_4 = arith.constant 0 : index
    %c0_5 = arith.constant 0 : index
    %9 = vector.load %arg6[%c0_4, %c0_5] : memref<128x128xf32, #tpu.memory_space<vmem>>, vector<128x128xf32>
    %c0_6 = arith.constant 0 : index
    %c0_7 = arith.constant 0 : index
    %10 = vector.load %arg2[%c0_6, %c0_7] : memref<128x128xf32, #tpu.memory_space<vmem>>, vector<128x128xf32>
    %11 = arith.truncf %10 : vector<128x128xf32> to vector<128x128xbf16>
    %cst_8 = arith.constant dense<0.000000e+00> : vector<128x128xf32>
    %12 = tpu.matmul %11, %8, %cst_8 {dimension_numbers = #tpu.dot_dimension_numbers<[1], [0], [0], [1], [0, 0, 1, 1], [], []>} : vector<128x128xbf16>, vector<128x128xbf16>, vector<128x128xf32> -> vector<128x128xf32>
    %13 = arith.addf %9, %12 : vector<128x128xf32>
    %c0_9 = arith.constant 0 : index
    %c0_10 = arith.constant 0 : index
    %14 = vector.load %arg6[%c0_9, %c0_10] : memref<128x128xf32, #tpu.memory_space<vmem>>, vector<128x128xf32>
    tpu.vector_store %arg6[%c0_9, %c0_10], %13 {strides = array<i32>} : memref<128x128xf32, #tpu.memory_space<vmem>>, vector<128x128xf32>,
    %c2_i32 = arith.constant 2 : i32
    %15 = arith.cmpi eq, %arg1, %c2_i32 : i32
    %16 = arith.extui %15 : i1 to i32
    %c0_i32_11 = arith.constant 0 : i32
    %17 = arith.cmpi ne, %16, %c0_i32_11 : i32
    scf.if %17 {
      %c0_12 = arith.constant 0 : index
      %c0_13 = arith.constant 0 : index
      %18 = vector.load %arg6[%c0_12, %c0_13] : memref<128x128xf32, #tpu.memory_space<vmem>>, vector<128x128xf32>
      %c0_14 = arith.constant 0 : index
      %c0_15 = arith.constant 0 : index
      %19 = vector.load %arg5[%c0_14, %c0_15] : memref<128x128xf32, #tpu.memory_space<vmem>>, vector<128x128xf32>
      tpu.vector_store %arg5[%c0_14, %c0_15], %18 {strides = array<i32>} : memref<128x128xf32, #tpu.memory_space<vmem>>, vector<128x128xf32>,
    } else {
    }
    return
  }
  func.func @transform_0(%arg0: i32, %arg1: i32) -> (i32, i32) {
    %c0_i32 = arith.constant 0 : i32
    return %arg0, %arg1 : i32, i32
  }
  func.func @transform_1(%arg0: i32, %arg1: i32) -> (i32, i32) {
    %c0_i32 = arith.constant 0 : i32
    %c0_i32_0 = arith.constant 0 : i32
    return %arg1, %c0_i32 : i32, i32
  }
  func.func @transform_2(%arg0: i32, %arg1: i32) -> (i32, i32) {
    %c0_i32 = arith.constant 0 : i32
    %c0_i32_0 = arith.constant 0 : i32
    %c0_i32_1 = arith.constant 0 : i32
    return %c0_i32, %c0_i32_0 : i32, i32
  }
  func.func @transform_3(%arg0: i32, %arg1: i32) -> (i32, i32) {
    %c0_i32 = arith.constant 0 : i32
    %c0_i32_0 = arith.constant 0 : i32
    return %arg0, %c0_i32 : i32, i32
  }
}

</mosaic_0001>

<bundles_post_ra>
// kernel: tpu_custom_call.1
= control target key start
LH: loop header
LB: loop body
LE: loop exit
PB: predicated region body
PF: predicated region fallthrough
CT: control target
= control target key end

     0   :  { %8 = vsyncpa [#allocation4], 0  ;;  %s1413_s0 = inlined_call_operand.hbm [shape: f32[384,384], index: 0, kind: input, shape index: {}]   ;;  %s1414_s1 = inlined_call_operand.vmem [shape: f32[384,32], index: 1, kind: input, shape index: {}]   ;;  %s1415_s2 = inlined_call_operand.vmem [shape: f32[32,128], index: 2, kind: input, shape index: {}]   ;;  %s1416_s3 = inlined_call_operand.hbm [shape: f32[384,128], index: 3, kind: output, shape index: {}]  }
   0x1   :  { %10 = vsyncpa [#allocation4 + $0x1], 0 }
   0x2   :  { %11 = vsyncpa [#allocation5], 0 }
   0x3   :  { %13 = vsyncpa [#allocation5 + $0x1], 0  ;;  %s1137_s12 = smov 0   ;;  %s1139_s13 = smov 0  }
   0x4   :  { %s1141_s14 = smov 0   ;;  %s1143_s15 = smov 0  }
   0x5   :  { %s1145_s16 = smov 0   ;;  %s1147_s17 = smov 0  }
   0x6   :  { %s1149_s18 = smov 0   ;;  %s1151_s19 = smov 0  }
   0x7   :  { %s1153_s20 = smov 0   ;;  %s1155_s21 = smov 0  }
   0x8   :  { %s1157_s22 = smov 0  }
   0x9 LB: > { %1420 = sst [smem:[#allocation9_spill]] %s1087_s17  ;;  %s727_s23 = sadd.s32 4294967295, %s1107_s22   ;;  %s1107_s22 = sphi %s1157_s22, %s19_s22   ;;  %s1103_s21 = sphi %s1155_s21, %s1441_s21   ;;  %s1099_s20 = sphi %s1153_s20, %s1440_s20   ;;  %s1095_s19 = sphi %s1151_s19, %s1439_s19   ;;  %s1091_s18 = sphi %s1149_s18, %s1438_s18   ;;  %s1087_s17 = sphi %s1147_s17, %s1430_s17   ;;  %s1083_s16 = sphi %s1145_s16, %s1437_s16   ;;  %s1079_s15 = sphi %s1143_s15, %s1436_s15   ;;  %s1075_s14 = sphi %s1141_s14, %s1435_s14   ;;  %s1071_s13 = sphi %s1139_s13, %s1434_s13   ;;  %s1067_s12 = sphi %s1137_s12, %s1433_s12  }
   0xa   : > { %s728_s24 = sadd.s32 4294967294, %s1107_s22   ;;  %s28_s25 = sadd.s32 1, %s1099_s20 }
   0xb   : > { %s31_s26 = sadd.s32 1, %s1103_s21  ;;  %p29_p0 = scmp.ge.s32.totalorder %s28_s25, 3 }
   0xc   : > { %s40_s27 = sadd.s32 1, %s1087_s17  ;;  %p47_p1 = scmp.ne.s32.totalorder %s1087_s17, %s1083_s16 }
   0xd   : > { %p48_p2 = scmp.eq.s32.totalorder %s1107_s22, 0  ;;  %s1443_s25 = smov (%p29_p0, %s28_s25), 0 }
   0xe   : > { %1421 = sst [smem:[#allocation10_spill]] %s1443_s25  ;;  %s1445_s26 = smov (!%p29_p0, %s31_s26), %s1103_s21 }
   0xf   : > { %s36_s28 = ssub.s32 %s1099_s20, %s1443_s25  ;;  %p1203_p3 = por %p48_p2, %p47_p1 }
  0x10   : > { %p33_p4 = scmp.ge.s32.totalorder %s1445_s26, 3  ;;  %p53_p5 = scmp.ne.s32.totalorder %s1083_s16, %s1079_s15 }
  0x11   : > { %p54_p6 = scmp.eq.s32.totalorder %s727_s23, 0  ;;  %s113_s30 = sadd.s32 1, %s1075_s14 }
  0x12   : > { %s1447_s26 = smov (%p33_p4, %s1445_s26), 0  ;;  %p123_p8 = scmp.ne.s32.totalorder %s1075_s14, %s1071_s13 }
  0x13   : > { %1423 = sst [smem:[#allocation11_spill]] %s1447_s26  ;;  %p1211_p7 = por %p54_p6, %p53_p5 }
  0x14   : > { %s35_s5 = ssub.s32 %s1103_s21, %s1447_s26  ;;  %p124_p9 = scmp.eq.s32.totalorder %s727_s23, 8 }
  0x15   : > { %s37_s6 = sor.u32 %s36_s28, %s35_s5  ;;  %p111_p10 = scmp.eq.s32.totalorder %s35_s5, 0 }
  0x16   : > { %p38_p11 = scmp.eq.s32.totalorder %s37_s6, 0  ;;  %p1219_p12 = por %p124_p9, %p123_p8 }
  0x17   : > { %s1224_s8 = scalar_select %p111_p10, %s1075_s14, %s113_s30  }
  0x18   : > { %s1227_s9 = scalar_select %p38_p11, %s1087_s17, %s40_s27  }
  0x19   : > { %p129_p13 = scmp.ne.s32.totalorder %s1071_s13, %s1067_s12  ;;  %p130_p0 = scmp.eq.s32.totalorder %s728_s24, 8 }
  0x1a   : > { %1426 = sst [smem:[#allocation12_spill]] %s1227_s9  ;;  %p863_p1 = scmp.lt.s32.totalorder %s1107_s22, 9 }
  0x1b   : > { %p1232_p2 = por %p130_p0, %p129_p13  ;;  %s153_s11 = sand.u32 1, %s1087_s17  }
  0x1c   : > { %s731_s15 = sshll.u32 %s153_s11, 7  ;;  %s850_s23 = smul.u32 48, %s1103_s21 }
  0x1d   : > { %s157_s28 = scalar_lea.vmem [#allocation3], %s731_s15  ;;  %p1240_p4 = pnand %p863_p1, %p1203_p3 }
  0x1e   : > { %s166_s5 = sshll.u32 %s157_s28, 4  ;;  %s163_s27 = sadd.s32 %s1099_s20, %s850_s23  ;;  %s167_s5 = int_to_ptr.vmem [resolvable:$true] %s166_s5 }
  0x1f   : > { %s734_s30 = sshll.u32 %s163_s27, 7  ;;  %s154_s9 = scalar_lea.sflag [#allocation4], %s153_s11 }
  0x20   : > { %s165_s25 = scalar_lea.hbm %s1413_s0, %s734_s30  ;;  %p961_p5 = pneg %p1240_p4 }
  0x21   : > { %s972_s17 = scalar_lea.vmem %s167_s5, 2048  ;;  %s1109_s29 = smov [#allocation3]  }
  0x22   : > { %p973_p6 = scmp.ne.s32.totalorder %s167_s5, %s972_s17  ;;  %s977_s15 = sshll.u32 %s1109_s29, 4  ;;  %s978_s15 = int_to_ptr.vmem [resolvable:$false] %s977_s15 }
  0x23   : > { %s979_s28 = scalar_lea.vmem %s978_s15, 4096  ;;  %p980_p3 = scmp.lt.s32.totalorder %s167_s5, %s978_s15 }
  0x24   : > { %p975_p8 = pnand %p973_p6, %p961_p5  ;;  %p981_p10 = scmp.lt.s32.totalorder %s979_s28, %s972_s17 }
  0x26   : > { %p976_p9 = pneg %p975_p8  ;;  %p982_p11 = por %p981_p10, %p980_p3 }
  0x28   : > { %p983_p13 = pnand %p982_p11, %p976_p9 }
  0x2a   : > { %986 = shalt.err (!%p983_p13)
}
  0x2b   : > { %s1110_s23 = smov 384   ;;  %s1111_s26 = smov 128  }
  0x2c   : > { %s1112_s11 = smov 8   ;;  %p735_p0 = scmp.ge.s32.totalorder %s1107_s22, 1 }
  0x2d   : > { %858 = dma.hbm_to_vmem [thread:$0]  (!%p1240_p4), %s165_s25, 2048, %s167_s5, %s154_s9, %s1110_s23, %s1111_s26, %s1112_s11  }
  0x2e   : > { %p183_p1 = scmp.lt.s32.totalorder %s1107_s22, 10 }
  0x30   : > { %p184_p5 = pnand %p735_p0, %p183_p1 }
  0x31   : > { %s189_s27 = sand.u32 (!%p184_p5), 1, %s1083_s16  }
  0x32   : > { %187 = sbr.rel (%p184_p5) target bundleno = 591 (0x24f), region = 32  ;;  %s736_s30 = sshll.u32 (!%p184_p5), %s189_s27, 7 }
  0x33   : > { %s190_s17 = scalar_lea.sflag (!%p184_p5), [#allocation4], %s189_s27  ;;  %s1255_s24 = scalar_lea.vmem (!%p184_p5), [#allocation3], %s736_s30 }
  0x37   : > { %1058 = dma.done.wait (%p1211_p7), %s190_s17, 2048  }
  0x38   : > { %1060 = vsyncadd (%p1211_p7), %s190_s17, 4294965248  ;;  %s218_s25 = sand.u32 1, %s1071_s13   ;;  %s738_s9 = sshll.u32 %s1091_s18, 4 }
  0x39   : > { %s737_s5 = sshll.u32 %s218_s25, 7  ;;  %p223_p4 = scmp.lt.s32.totalorder %s738_s9, 47 }
  0x3a   : > { %s1270_s23 = scalar_lea.vmem [#allocation6], %s737_s5  ;;  %p740_p6 = scmp.ne.s32.totalorder %s1091_s18, 0 }
  0x3b   : > { %s1449_s9 = smov (!%p223_p4, %s738_s9), 47 }
  0x3c   : > { %s739_s6 = sshll.u32 %s1449_s9, 3  ;;  %233 = sbr.rel (%p740_p6) target bundleno = 74 (0x4a), region = 40 }
  0x3d   : > { %s1268_s28 = scalar_lea.vmem %s1414_s1, %s739_s6 }
  0x41   : > { %v1113_v0 = vmov 0.0  }
  0x42   : > { %234 = vst [vmem:[#allocation2 + $0x30] sm:$0xff] %v1113_v0  ;;  %235 = vst [vmem:[#allocation2] sm:$0xff] %v1113_v0 }
  0x43   : > { %236 = vst [vmem:[#allocation2 + $0x58] sm:$0xff] %v1113_v0  ;;  %237 = vst [vmem:[#allocation2 + $0x18] sm:$0xff] %v1113_v0 }
  0x44   : > { %238 = vst [vmem:[#allocation2 + $0x50] sm:$0xff] %v1113_v0  ;;  %239 = vst [vmem:[#allocation2 + $0x68] sm:$0xff] %v1113_v0 }
  0x45   : > { %240 = vst [vmem:[#allocation2 + $0x8] sm:$0xff] %v1113_v0  ;;  %241 = vst [vmem:[#allocation2 + $0x48] sm:$0xff] %v1113_v0 }
  0x46   : > { %242 = vst [vmem:[#allocation2 + $0x40] sm:$0xff] %v1113_v0  ;;  %243 = vst [vmem:[#allocation2 + $0x20] sm:$0xff] %v1113_v0 }
  0x47   : > { %244 = vst [vmem:[#allocation2 + $0x10] sm:$0xff] %v1113_v0  ;;  %245 = vst [vmem:[#allocation2 + $0x38] sm:$0xff] %v1113_v0 }
  0x48   : > { %246 = vst [vmem:[#allocation2 + $0x60] sm:$0xff] %v1113_v0  ;;  %247 = vst [vmem:[#allocation2 + $0x70] sm:$0xff] %v1113_v0 }
  0x49   : > { %248 = vst [vmem:[#allocation2 + $0x78] sm:$0xff] %v1113_v0  ;;  %249 = vst [vmem:[#allocation2 + $0x28] sm:$0xff] %v1113_v0 }
  0x4a PF: > { %v276_v1 = vld [vmem:[%s1415_s2 + $0x10] sm:$0xff]  ;;  %v277_v2 = vld [vmem:[%s1415_s2 + $0x18] sm:$0xff]  ;;  %v274_v3 = vld [vmem:[%s1415_s2] sm:$0xff]  ;;  %vm280_vm0 = vcmask 261120   ;;  %p749_p7 = scmp.ne.s32.totalorder %s1091_s18, 2 }
  0x4b   : > { %v279_v4 = vpack.c.bf16 %v277_v2, %v276_v1  ;;  %v275_v5 = vld [vmem:[%s1415_s2 + $0x8] sm:$0xff]  ;;  %v250_v6 = vld [vmem:[%s1268_s28] sm:$0xff]  ;;  %v252_v10 = vld [vmem:[%s1268_s28 + $0x10] sm:$0xff] }
  0x4c   : > { %v251_v7 = vld [vmem:[%s1268_s28 + $0x8] sm:$0xff]  ;;  %v278_v8 = vpack.c.bf16 %v275_v5, %v274_v3  ;;  %v253_v11 = vld [vmem:[%s1268_s28 + $0x18] sm:$0xff]  ;;  %v254_v12 = vld [vmem:[%s1268_s28 + $0x20] sm:$0xff] }
  0x4d   : > { %v266_v9 = vpack.c.bf16 %v251_v7, %v250_v6  ;;  %782 = vmatprep.subr.bf16.mxu0 %v279_v4  ;;  %v255_v13 = vld [vmem:[%s1268_s28 + $0x28] sm:$0xff]  ;;  %v267_v14 = vpack.c.bf16 %v253_v11, %v252_v10  ;;  %v256_v16 = vld [vmem:[%s1268_s28 + $0x30] sm:$0xff]  ;;  %v257_v17 = vld [vmem:[%s1268_s28 + $0x38] sm:$0xff] }
  0x4e   : > { %783 = vmatpush3.bf16.msra.mxu0 %v279_v4  ;;  %v268_v15 = vpack.c.bf16 %v255_v13, %v254_v12  ;;  %v258_v18 = vld [vmem:[%s1268_s28 + $0x40] sm:$0xff]  ;;  %v259_v19 = vld [vmem:[%s1268_s28 + $0x48] sm:$0xff]  ;;  %v269_v20 = vpack.c.bf16 %v257_v17, %v256_v16  ;;  %v260_v22 = vld [vmem:[%s1268_s28 + $0x50] sm:$0xff] }
  0x4f   : > { %786 = vmatprep.mubr.msk.bf16.mxu0 %vm280_vm0, %v266_v9  ;;  %784 = vmatprep.subr.bf16.mxu0 %v278_v8  ;;  %v270_v21 = vpack.c.bf16 %v259_v19, %v258_v18  ;;  %v261_v23 = vld [vmem:[%s1268_s28 + $0x58] sm:$0xff]  ;;  %v262_v24 = vld [vmem:[%s1268_s28 + $0x60] sm:$0xff]  ;;  %v263_v25 = vld [vmem:[%s1268_s28 + $0x68] sm:$0xff] }
  0x50   : > { %v271_v26 = vpack.c.bf16 %v261_v23, %v260_v22  ;;  %v272_v27 = vpack.c.bf16 %v263_v25, %v262_v24  ;;  %v264_v28 = vld [vmem:[%s1268_s28 + $0x70] sm:$0xff]  ;;  %v265_v29 = vld [vmem:[%s1268_s28 + $0x78] sm:$0xff]  ;;  %v430_v31 = vld [vmem:[%s1255_s24 + $0x20] sm:$0xff] }
  0x51   : > { %v273_v30 = vpack.c.bf16 %v265_v29, %v264_v28  ;;  %v431_v32 = vld [vmem:[%s1255_s24 + $0x28] sm:$0xff]  ;;  %v426_v34 = vld [vmem:[%s1255_s24] sm:$0xff]  ;;  %v432_v61 = vld [vmem:[%s1255_s24 + $0x30] sm:$0xff] }
  0x52   : > { %785 = vmatpush3.bf16.msra.mxu0 %v278_v8  ;;  %v444_v33 = vpack.c.bf16 %v431_v32, %v430_v31  ;;  %v427_v35 = vld [vmem:[%s1255_s24 + $0x8] sm:$0xff]  ;;  %v433_v62 = vld [vmem:[%s1255_s24 + $0x38] sm:$0xff]  ;;  %v428_v63 = vld [vmem:[%s1255_s24 + $0x10] sm:$0xff] }
  0x53   : > { %v442_v36 = vpack.c.bf16 %v427_v35, %v426_v34  ;;  %v429_v0 = vld [vmem:[%s1255_s24 + $0x18] sm:$0xff]  ;;  %v434_v1 = vld [vmem:[%s1255_s24 + $0x40] sm:$0xff]  ;;  %v435_v2 = vld [vmem:[%s1255_s24 + $0x48] sm:$0xff]  ;;  %v445_v3 = vpack.c.bf16 %v433_v62, %v432_v61 }
  0x54   : > { %822 = vmatprep.mubr.bf16.mxu1 %v444_v33  ;;  %v443_v4 = vpack.c.bf16 %v429_v0, %v428_v63  ;;  %v446_v5 = vpack.c.bf16 %v435_v2, %v434_v1  ;;  %v436_v6 = vld [vmem:[%s1255_s24 + $0x50] sm:$0xff]  ;;  %v437_v7 = vld [vmem:[%s1255_s24 + $0x58] sm:$0xff]  ;;  %v438_v8 = vld [vmem:[%s1255_s24 + $0x60] sm:$0xff] }
  0x55   : > { %787 = vmatmul.mubr.msk.bf16.vlgmr.msra.gmra.mxu0 %vm280_vm0, %v267_v14  ;;  %v439_v9 = vld [vmem:[%s1255_s24 + $0x68] sm:$0xff]  ;;  %v447_v10 = vpack.c.bf16 %v437_v7, %v436_v6  ;;  %v440_v12 = vld [vmem:[%s1255_s24 + $0x70] sm:$0xff]  ;;  %v441_v13 = vld [vmem:[%s1255_s24 + $0x78] sm:$0xff] }
  0x56   : > { %790 = vmatprep.mubr.msk.bf16.mxu0 %vm280_vm0, %v268_v15  ;;  %v448_v11 = vpack.c.bf16 %v439_v9, %v438_v8  ;;  %v449_v14 = vpack.c.bf16 %v441_v13, %v440_v12  ;;  %v416_v15 = vld [vmem:[#allocation2 + $0x8] sm:$0xff]  ;;  %v412_v16 = vld [vmem:[#allocation2 + $0x58] sm:$0xff]  ;;  %v414_v18 = vld [vmem:[#allocation2 + $0x50] sm:$0xff] }
  0x57   : > { %v417_v24 = vld [vmem:[#allocation2 + $0x48] sm:$0xff]  ;;  %v411_v32 = vld [vmem:[#allocation2] sm:$0xff] }
  0x5d   : > { %791 = vmatmul.mubr.msk.bf16.gmra.mxu0 %vm280_vm0, %v269_v20  ;;  %v410_v20 = vld [vmem:[#allocation2 + $0x30] sm:$0xff] }
  0x5e   : > { %794 = vmatprep.mubr.msk.bf16.mxu0 %vm280_vm0, %v270_v21 }
  0x65   : > { %795 = vmatmul.mubr.msk.bf16.gmra.mxu0 %vm280_vm0, %v271_v26  ;;  %v413_v26 = vld [vmem:[#allocation2 + $0x18] sm:$0xff] }
  0x66   : > { %798 = vmatprep.mubr.msk.bf16.mxu0 %vm280_vm0, %v272_v27 }
  0x6d   : > { %799 = vmatmul.mubr.msk.bf16.gmra.mxu0 %vm280_vm0, %v273_v30  ;;  %v415_v30 = vld [vmem:[#allocation2 + $0x68] sm:$0xff] }
  0x6e   : > { %818 = vmatprep.mubr.bf16.mxu0 %v442_v36  ;;  %v420_v36 = vld [vmem:[#allocation2 + $0x10] sm:$0xff] }
 0x115   : > { %v788_v37 = vpop.f32.mrf.mxu0 }
 0x117   : > { %v339_v38 = vpop.f32.mrf.mxu0 }
 0x119   : > { %v789_v39 = vpop.f32.mrf.mxu0 }
 0x11a   : > { %v403_v59 = vpack.c.bf16 %v789_v39, %v788_v37 }
 0x11b   : > { %v342_v40 = vpop.f32.mrf.mxu0 }
 0x11c   : > { %v402_v60 = vpack.c.bf16 %v342_v40, %v339_v38 }
 0x11d   : > { %v792_v41 = vpop.f32.mrf.mxu0 }
 0x11f   : > { %v355_v42 = vpop.f32.mrf.mxu0 }
 0x121   : > { %v793_v43 = vpop.f32.mrf.mxu0 }
 0x122   : > { %v405_v57 = vpack.c.bf16 %v793_v43, %v792_v41  ;;  %v418_v41 = vld [vmem:[#allocation2 + $0x40] sm:$0xff] }
 0x123   : > { %v358_v44 = vpop.f32.mrf.mxu0 }
 0x124   : > { %v404_v58 = vpack.c.bf16 %v358_v44, %v355_v42  ;;  %v421_v44 = vld [vmem:[#allocation2 + $0x38] sm:$0xff] }
 0x125   : > { %v796_v45 = vpop.f32.mrf.mxu0 }
 0x127   : > { %v371_v46 = vpop.f32.mrf.mxu0 }
 0x129   : > { %v797_v47 = vpop.f32.mrf.mxu0 }
 0x12a   : > { %v407_v55 = vpack.c.bf16 %v797_v47, %v796_v45  ;;  %v419_v47 = vld [vmem:[#allocation2 + $0x20] sm:$0xff] }
 0x12b   : > { %v374_v48 = vpop.f32.mrf.mxu0 }
 0x12c   : > { %v406_v56 = vpack.c.bf16 %v374_v48, %v371_v46 }
 0x12d   : > { %v800_v49 = vpop.f32.mrf.mxu0 }
 0x12f   : > { %v387_v50 = vpop.f32.mrf.mxu0 }
 0x131   : > { %v801_v51 = vpop.f32.mrf.mxu0 }
 0x132   : > { %v409_v52 = vpack.c.bf16 %v801_v51, %v800_v49 }
 0x133   : > { %v390_v53 = vpop.f32.mrf.mxu0 }
 0x134   : > { %v408_v54 = vpack.c.bf16 %v390_v53, %v387_v50  ;;  %802 = vmatprep.subr.bf16.mxu0 %v409_v52  ;;  %834 = vmatprep.subr.bf16.mxu1 %v409_v52  ;;  %v424_v50 = vld [vmem:[#allocation2 + $0x78] sm:$0xff]  ;;  %v422_v53 = vld [vmem:[#allocation2 + $0x60] sm:$0xff] }
 0x135   : > { %803 = vmatpush3.bf16.msra.mxu0 %v409_v52  ;;  %842 = vmatpush3.bf16.msra.mxu1 %v409_v52 }
 0x136   : > { %804 = vmatprep.subr.bf16.mxu0 %v408_v54  ;;  %835 = vmatprep.subr.bf16.mxu1 %v408_v54 }
 0x139   : > { %805 = vmatpush3.bf16.msra.mxu0 %v408_v54  ;;  %843 = vmatpush3.bf16.msra.mxu1 %v408_v54 }
 0x13a   : > { %806 = vmatprep.subr.bf16.mxu0 %v407_v55  ;;  %836 = vmatprep.subr.bf16.mxu1 %v407_v55 }
 0x13d   : > { %807 = vmatpush3.bf16.msra.mxu0 %v407_v55  ;;  %844 = vmatpush3.bf16.msra.mxu1 %v407_v55 }
 0x13e   : > { %808 = vmatprep.subr.bf16.mxu0 %v406_v56  ;;  %837 = vmatprep.subr.bf16.mxu1 %v406_v56 }
 0x141   : > { %809 = vmatpush3.bf16.msra.mxu0 %v406_v56  ;;  %845 = vmatpush3.bf16.msra.mxu1 %v406_v56  ;;  %v425_v56 = vld [vmem:[#allocation2 + $0x28] sm:$0xff] }
 0x142   : > { %810 = vmatprep.subr.bf16.mxu0 %v405_v57  ;;  %838 = vmatprep.subr.bf16.mxu1 %v405_v57 }
 0x145   : > { %811 = vmatpush3.bf16.msra.mxu0 %v405_v57  ;;  %846 = vmatpush3.bf16.msra.mxu1 %v405_v57 }
 0x146   : > { %812 = vmatprep.subr.bf16.mxu0 %v404_v58  ;;  %839 = vmatprep.subr.bf16.mxu1 %v404_v58 }
 0x149   : > { %813 = vmatpush3.bf16.msra.mxu0 %v404_v58  ;;  %847 = vmatpush3.bf16.msra.mxu1 %v404_v58 }
 0x14a   : > { %814 = vmatprep.subr.bf16.mxu0 %v403_v59  ;;  %840 = vmatprep.subr.bf16.mxu1 %v403_v59 }
 0x14d   : > { %815 = vmatpush3.bf16.msra.mxu0 %v403_v59  ;;  %848 = vmatpush3.bf16.msra.mxu1 %v403_v59  ;;  %v423_v59 = vld [vmem:[#allocation2 + $0x70] sm:$0xff] }
 0x14e   : > { %816 = vmatprep.subr.bf16.mxu0 %v402_v60  ;;  %841 = vmatprep.subr.bf16.mxu1 %v402_v60 }
 0x151   : > { %817 = vmatpush3.bf16.msra.mxu0 %v402_v60  ;;  %849 = vmatpush3.bf16.msra.mxu1 %v402_v60 }
 0x154   : > { %823 = vmatmul.mubr.bf16.vlgmr.msra.gmra.mxu1 %v445_v3  ;;  %819 = vmatmul.mubr.bf16.vlgmr.msra.gmra.mxu0 %v443_v4 }
 0x155   : > { %826 = vmatprep.mubr.bf16.mxu1 %v446_v5 }
 0x15c   : > { %827 = vmatmul.mubr.bf16.gmra.mxu1 %v447_v10 }
 0x15d   : > { %830 = vmatprep.mubr.bf16.mxu1 %v448_v11 }
 0x164   : > { %831 = vmatmul.mubr.bf16.gmra.mxu1 %v449_v14 }
 0x214   : > { %v824_v17 = vpop.f32.mrf.mxu1  ;;  %v820_v19 = vpop.f32.mrf.mxu0 }
 0x215   : > { %v553_v21 = vadd.f32 %v824_v17, %v416_v15  ;;  %v549_v22 = vadd.f32 %v820_v19, %v412_v16 }
 0x216   : > { %v500_v23 = vpop.f32.mrf.mxu1  ;;  %v484_v25 = vpop.f32.mrf.mxu0 }
 0x217   : > { %569 = vst [vmem:[#allocation2 + $0x8] sm:$0xff] %v553_v21  ;;  %v551_v27 = vadd.f32 %v500_v23, %v414_v18  ;;  %565 = vst [vmem:[#allocation2 + $0x58] sm:$0xff] %v549_v22  ;;  %v547_v28 = vadd.f32 %v484_v25, %v410_v20 }
 0x218   : > { %v825_v29 = vpop.f32.mrf.mxu1  ;;  %v821_v31 = vpop.f32.mrf.mxu0 }
 0x219   : > { %567 = vst [vmem:[#allocation2 + $0x50] sm:$0xff] %v551_v27  ;;  %v554_v33 = vadd.f32 %v825_v29, %v417_v24  ;;  %563 = vst [vmem:[#allocation2 + $0x30] sm:$0xff] %v547_v28  ;;  %v550_v34 = vadd.f32 %v821_v31, %v413_v26 }
 0x21a   : > { %v503_v35 = vpop.f32.mrf.mxu1  ;;  %v487_v37 = vpop.f32.mrf.mxu0 }
 0x21b   : > { %570 = vst [vmem:[#allocation2 + $0x48] sm:$0xff] %v554_v33  ;;  %v552_v38 = vadd.f32 %v503_v35, %v415_v30  ;;  %566 = vst [vmem:[#allocation2 + $0x18] sm:$0xff] %v550_v34  ;;  %v548_v39 = vadd.f32 %v487_v37, %v411_v32 }
 0x21c   : > { %v828_v40 = vpop.f32.mrf.mxu1 }
 0x21d   : > { %568 = vst [vmem:[#allocation2 + $0x68] sm:$0xff] %v552_v38  ;;  %v557_v42 = vadd.f32 %v828_v40, %v420_v36  ;;  %564 = vst [vmem:[#allocation2] sm:$0xff] %v548_v39 }
 0x21e   : > { %v516_v43 = vpop.f32.mrf.mxu1 }
 0x21f   : > { %573 = vst [vmem:[#allocation2 + $0x10] sm:$0xff] %v557_v42  ;;  %v555_v45 = vadd.f32 %v516_v43, %v418_v41 }
 0x220   : > { %v829_v46 = vpop.f32.mrf.mxu1 }
 0x221   : > { %571 = vst [vmem:[#allocation2 + $0x40] sm:$0xff] %v555_v45  ;;  %v558_v48 = vadd.f32 %v829_v46, %v421_v44 }
 0x222   : > { %v519_v49 = vpop.f32.mrf.mxu1 }
 0x223   : > { %574 = vst [vmem:[#allocation2 + $0x38] sm:$0xff] %v558_v48  ;;  %v556_v51 = vadd.f32 %v519_v49, %v419_v47 }
 0x224   : > { %v832_v52 = vpop.f32.mrf.mxu1 }
 0x225   : > { %572 = vst [vmem:[#allocation2 + $0x20] sm:$0xff] %v556_v51  ;;  %v561_v54 = vadd.f32 %v832_v52, %v424_v50 }
 0x226   : > { %v532_v55 = vpop.f32.mrf.mxu1 }
 0x227   : > { %577 = vst [vmem:[#allocation2 + $0x78] sm:$0xff] %v561_v54  ;;  %v559_v57 = vadd.f32 %v532_v55, %v422_v53 }
 0x228   : > { %v833_v58 = vpop.f32.mrf.mxu1 }
 0x229   : > { %575 = vst [vmem:[#allocation2 + $0x60] sm:$0xff] %v559_v57  ;;  %v562_v60 = vadd.f32 %v833_v58, %v425_v56  ;;  %582 = sbr.rel (%p749_p7) target bundleno = 567 (0x237), region = 44 }
 0x22a   : > { %v535_v61 = vpop.f32.mrf.mxu1 }
 0x22b   : > { %578 = vst [vmem:[#allocation2 + $0x28] sm:$0xff] %v562_v60  ;;  %v560_v62 = vadd.f32 %v535_v61, %v423_v59 }
 0x22d   : > { %576 = vst [vmem:[#allocation2 + $0x70] sm:$0xff] %v560_v62 }
 0x22e   : > { %v583_v63 = vld [vmem:[#allocation2 + $0x30] sm:$0xff]  ;;  %v584_v0 = vld [vmem:[#allocation2] sm:$0xff]  ;;  %v585_v1 = vld [vmem:[#allocation2 + $0x58] sm:$0xff] }
 0x22f   : > { %599 = vst [vmem:[%s1270_s23] sm:$0xff] %v583_v63  ;;  %600 = vst [vmem:[%s1270_s23 + $0x8] sm:$0xff] %v584_v0  ;;  %v586_v2 = vld [vmem:[#allocation2 + $0x18] sm:$0xff]  ;;  %v587_v3 = vld [vmem:[#allocation2 + $0x50] sm:$0xff] }
 0x230   : > { %601 = vst [vmem:[%s1270_s23 + $0x10] sm:$0xff] %v585_v1  ;;  %v588_v4 = vld [vmem:[#allocation2 + $0x68] sm:$0xff]  ;;  %602 = vst [vmem:[%s1270_s23 + $0x18] sm:$0xff] %v586_v2  ;;  %v591_v7 = vld [vmem:[#allocation2 + $0x40] sm:$0xff] }
 0x231   : > { %603 = vst [vmem:[%s1270_s23 + $0x20] sm:$0xff] %v587_v3  ;;  %604 = vst [vmem:[%s1270_s23 + $0x28] sm:$0xff] %v588_v4  ;;  %v589_v5 = vld [vmem:[#allocation2 + $0x8] sm:$0xff]  ;;  %v592_v8 = vld [vmem:[#allocation2 + $0x20] sm:$0xff] }
 0x232   : > { %v590_v6 = vld [vmem:[#allocation2 + $0x48] sm:$0xff]  ;;  %605 = vst [vmem:[%s1270_s23 + $0x30] sm:$0xff] %v589_v5  ;;  %607 = vst [vmem:[%s1270_s23 + $0x40] sm:$0xff] %v591_v7  ;;  %v593_v9 = vld [vmem:[#allocation2 + $0x10] sm:$0xff] }
 0x233   : > { %606 = vst [vmem:[%s1270_s23 + $0x38] sm:$0xff] %v590_v6  ;;  %v594_v10 = vld [vmem:[#allocation2 + $0x38] sm:$0xff]  ;;  %608 = vst [vmem:[%s1270_s23 + $0x48] sm:$0xff] %v592_v8  ;;  %v595_v11 = vld [vmem:[#allocation2 + $0x60] sm:$0xff] }
 0x234   : > { %609 = vst [vmem:[%s1270_s23 + $0x50] sm:$0xff] %v593_v9  ;;  %610 = vst [vmem:[%s1270_s23 + $0x58] sm:$0xff] %v594_v10  ;;  %v596_v12 = vld [vmem:[#allocation2 + $0x70] sm:$0xff]  ;;  %v597_v13 = vld [vmem:[#allocation2 + $0x78] sm:$0xff] }
 0x235   : > { %611 = vst [vmem:[%s1270_s23 + $0x60] sm:$0xff] %v595_v11  ;;  %612 = vst [vmem:[%s1270_s23 + $0x68] sm:$0xff] %v596_v12  ;;  %v598_v14 = vld [vmem:[#allocation2 + $0x28] sm:$0xff] }
 0x236   : > { %613 = vst [vmem:[%s1270_s23 + $0x70] sm:$0xff] %v597_v13  ;;  %614 = vst [vmem:[%s1270_s23 + $0x78] sm:$0xff] %v598_v14 }
 0x237 PF: > { %s755_s18 = sshll.u32 %s1095_s19, 11  ;;  %s629_s15 = sshll.u32 %s1270_s23, 4  ;;  %s1349_s15 = int_to_ptr.vmem [resolvable:$true] %s629_s15 }
 0x238   : > { %s1346_s29 = scalar_lea.hbm %s1416_s3, %s755_s18  ;;  %s1353_s28 = scalar_lea.sflag [#allocation5], %s218_s25 }
 0x239   : > { %s987_s4 = scalar_lea.vmem %s1349_s15, 2048  ;;  %s1114_s19 = smov [#allocation6]  }
 0x23a   : > { %p988_p8 = scmp.ne.s32.totalorder %s1349_s15, %s987_s4  ;;  %s991_s26 = sshll.u32 %s1114_s19, 4  ;;  %s992_s26 = int_to_ptr.vmem [resolvable:$false] %s991_s26 }
 0x23b   : > { %s993_s11 = scalar_lea.vmem %s992_s26, 4096  ;;  %p994_p10 = scmp.lt.s32.totalorder %s1349_s15, %s992_s26 }
 0x23c   : > { %p989_p9 = pnand %p988_p8, %p1219_p12  ;;  %p995_p11 = scmp.lt.s32.totalorder %s993_s11, %s987_s4 }
 0x23e   : > { %p990_p3 = pneg %p989_p9  ;;  %p996_p13 = por %p995_p11, %p994_p10 }
 0x240   : > { %p997_p0 = pnand %p996_p13, %p990_p3 }
 0x242   : > { %1000 = shalt.err (!%p997_p0)
}
 0x243   : > { %s1001_s25 = scalar_lea.hbm %s1346_s29, 2048  ;;  %s1005_s30 = scalar_lea.hbm %s1416_s3, 6144 }
 0x244   : > { %p1002_p1 = scmp.ne.s32.totalorder %s1346_s29, %s1001_s25  ;;  %p1006_p6 = scmp.lt.s32.totalorder %s1346_s29, %s1416_s3 }
 0x245   : > { %p1007_p7 = scmp.lt.s32.totalorder %s1005_s30, %s1001_s25 }
 0x246   : > { %p1003_p5 = pnand %p1002_p1, %p1219_p12 }
 0x247   : > { %p1008_p8 = por %p1007_p7, %p1006_p6 }
 0x248   : > { %p1004_p4 = pneg %p1003_p5 }
 0x24a   : > { %p1009_p9 = pnand %p1008_p8, %p1004_p4 }
 0x24c   : > { %1012 = shalt.err (!%p1009_p9)
}
 0x24d   : > { %s1115_s5 = smov 128   ;;  %s1116_s18 = smov 8  }
 0x24e   : > { %853 = dma.vmem_to_hbm [thread:$0]  (%p1219_p12), %s1349_s15, 2048, %s1346_s29, %s1353_s28, %s1115_s5, %s1115_s5, %s1116_s18  }
 0x24f PF: > { %p864_p3 = scmp.ge.s32.totalorder %s1107_s22, 2  ;;  %s644_s24 = sand.u32 1, %s1067_s12  }
 0x250   : > { %s645_s6 = scalar_lea.sflag [#allocation5], %s644_s24 }
 0x251   : > { %p860_p10 = pnand %p864_p3, %p1232_p2 }
 0x253   : > { %p861_p11 = pneg %p860_p10 }
 0x255   : > { %1062 = dma.done.wait (%p861_p11), %s645_s6, 2048  }
 0x256   : > { %1064 = vsyncadd (%p861_p11), %s645_s6, 4294965248  ;;  %s19_s22 = sadd.s32 1, %s1107_s22   ;;  %s1429_s7 = sld [smem:[#allocation9_spill]] }
 0x257   : > { %p16_p13 = scmp.ge.s32.totalorder %s19_s22, 11   ;;  %s1430_s17 = sld [smem:[#allocation12_spill]] }
 0x258   : > { %s1431_s29 = sld [smem:[#allocation10_spill]]  ;;  %s1433_s12 = smov %s1071_s13 }
 0x259   : > { %s1432_s28 = sld [smem:[#allocation11_spill]]  ;;  %s1434_s13 = smov %s1075_s14 }
 0x25a   : > { %s1435_s14 = smov %s1224_s8  ;;  %s1436_s15 = smov %s1083_s16 }
 0x25b   : > { %s1438_s18 = smov %s1099_s20  ;;  %s1439_s19 = smov %s1103_s21 }
 0x25c   : > { %s1437_s16 = smov %s1429_s7  ;;  %18 = sbr.rel (!%p16_p13) target bundleno = 9 (0x9), region = 88 }
 0x25e   : > { %s1440_s20 = smov %s1431_s29 }
 0x25f   : > { %s1441_s21 = smov %s1432_s28 }
 0x261   :  { %650 = vsyncpa [#allocation4], 1 }
 0x262   :  { %652 = vsyncpa [#allocation4 + $0x1], 1 }
 0x263   :  { %653 = vsyncpa [#allocation5], 1 }
 0x264   :  { %655 = vsyncpa [#allocation5 + $0x1], 1 }

</bundles_post_ra>
